<compile_context>
chip_gen: v7x
topology: tpu7x:2x2x1
jax: 0.10.0
libtpu: 0.0.40
codegen_flags: <defaults>
</compile_context>

<pallas_src>
import jax
import jax.numpy as jnp
from jax.experimental import pallas as pl
from jax.experimental.pallas import tpu as pltpu


# ---------------------------------------------------------------------------
# Model hyper-parameters (synthetic, deterministic).
# ---------------------------------------------------------------------------
OBS_SIZE = 32
HIDDEN = 64
# 4 policy heads (matches ent_loss_heads_scale having 4 entries).
HEAD_SIZES = (3, 5, 4, 4)
ACTION_SIZE = sum(HEAD_SIZES)          # 16 policy logits
OUT_WIDTH = ACTION_SIZE + 1            # + 1 value  (= 17 real columns)
TB_MAX = 4096                          # batch-tile cap (HBM-bound kernel)
VMEM_LIMIT_BYTES = 32 * 1024 * 1024    # safe on v5e/v6e/v7x; ~12 MiB used


def _cdiv(a: int, b: int) -> int:
    return -(-a // b)


def _round_up(n: int, m: int) -> int:
    return ((n + m - 1) // m) * m


def _choose_tiling(batch: int):
    """Pick (tile_rows, grid) so that:
      * per-step overhead is amortized (tile up to TB_MAX rows),
      * padding is handled by a cdiv grid (at most one partial last tile),
      * grid >= 2 when B > 16 so v7x megacore can use both TensorCores,
      * block rows are a multiple of 8 (sublane rule) and never exceed B.
    """
    if batch <= 8:
        return batch, 1                       # block == full array dims
    n_tiles = _cdiv(batch, TB_MAX)
    if batch > 16:
        n_tiles = max(n_tiles, 2)             # feed both v7x TensorCores
    tb = _round_up(_cdiv(batch, n_tiles), 8)
    tb = min(tb, (batch // 8) * 8)            # keep block rows <= array rows
    return tb, _cdiv(batch, tb)


def _ac_kernel(x_ref, w1_ref, b1_ref, w2_ref, b2_ref, wh_ref, bh_ref, out_ref):
    """Actor-critic trunk + fused (policy | value) head, one batch tile.

    x:   (TB, OBS_SIZE)        f32 (cast to bf16 in-kernel for the MXU)
    w1:  (OBS_SIZE, HIDDEN)    bf16    b1: (1, HIDDEN)    f32
    w2:  (HIDDEN,  HIDDEN)     bf16    b2: (1, HIDDEN)    f32
    wh:  (HIDDEN, OUT_WIDTH)   bf16    bh: (1, OUT_WIDTH) f32
    out: (TB, OUT_WIDTH) f32 = [policy logits | value]
    """
    # In-kernel bf16 cast: a VPU op fully hidden under the input DMA.
    x = x_ref[...].astype(jnp.bfloat16)

    # bf16 MXU operands, f32 accumulation; bias add + tanh in f32
    # (v5e VPU/EUP have no bf16).
    h1 = jnp.tanh(
        jnp.dot(x, w1_ref[...], preferred_element_type=jnp.float32)
        + b1_ref[...]
    )
    h2 = jnp.tanh(
        jnp.dot(h1.astype(jnp.bfloat16), w2_ref[...],
                preferred_element_type=jnp.float32)
        + b2_ref[...]
    )
    out_ref[...] = (
        jnp.dot(h2.astype(jnp.bfloat16), wh_ref[...],
                preferred_element_type=jnp.float32)
        + bh_ref[...]
    )


def prepare_params(params):
    """One-time weight prep (bf16 MXU casts), hoisted out of the per-call
    forward path. Biases stay f32."""
    w1, b1, w2, b2, wh, bh = params
    return (w1.astype(jnp.bfloat16), b1.astype(jnp.float32),
            w2.astype(jnp.bfloat16), b2.astype(jnp.float32),
            wh.astype(jnp.bfloat16), bh.astype(jnp.float32))


@jax.jit
def agent_forward(x, prepared_params):
    """Pallas-backed equivalent of Agent.forward -> model(x, state).

    `x` is f32 (B, OBS_SIZE); `prepared_params` comes from prepare_params().
    Returns (per-head logits tuple, value (B,)).
    """
    B = x.shape[0]
    w1, b1, w2, b2, wh, bh = prepared_params

    tb, n_tiles = _choose_tiling(B)

    cost = pl.CostEstimate(
        flops=2 * B * (OBS_SIZE * HIDDEN + HIDDEN * HIDDEN
                       + HIDDEN * OUT_WIDTH),
        transcendentals=2 * B * HIDDEN,
        bytes_accessed=(B * OBS_SIZE * 4 + B * OUT_WIDTH * 4
                        + (OBS_SIZE * HIDDEN + HIDDEN * HIDDEN
                           + HIDDEN * OUT_WIDTH) * 2
                        + (HIDDEN + HIDDEN + OUT_WIDTH) * 4),
    )

    out = pl.pallas_call(
        _ac_kernel,
        out_shape=jax.ShapeDtypeStruct((B, OUT_WIDTH), jnp.float32),
        grid_spec=pltpu.PrefetchScalarGridSpec(
            num_scalar_prefetch=0,
            grid=(n_tiles,),
            in_specs=[
                pl.BlockSpec((tb, OBS_SIZE), lambda i: (i, 0)),          # x
                pl.BlockSpec((OBS_SIZE, HIDDEN), lambda i: (0, 0)),      # w1
                pl.BlockSpec((1, HIDDEN), lambda i: (0, 0)),             # b1
                pl.BlockSpec((HIDDEN, HIDDEN), lambda i: (0, 0)),        # w2
                pl.BlockSpec((1, HIDDEN), lambda i: (0, 0)),             # b2
                pl.BlockSpec((HIDDEN, OUT_WIDTH), lambda i: (0, 0)),     # wh
                pl.BlockSpec((1, OUT_WIDTH), lambda i: (0, 0)),          # bh
            ],
            out_specs=pl.BlockSpec((tb, OUT_WIDTH), lambda i: (i, 0)),
        ),
        compiler_params=pltpu.CompilerParams(
            dimension_semantics=("parallel",),
            vmem_limit_bytes=VMEM_LIMIT_BYTES,
        ),
        cost_estimate=cost,
    )(x, w1, b1, w2, b2, wh, bh)

    # Cheap per-head split of the exact-width (B, 17) output.
    logits_flat = out[:, :ACTION_SIZE]
    value = out[:, ACTION_SIZE]

    heads = []
    off = 0
    for hs in HEAD_SIZES:
        heads.append(logits_flat[:, off:off + hs])
        off += hs
    return tuple(heads), value


def init_params(key):
    ks = jax.random.split(key, 3)
    scale1 = 1.0 / jnp.sqrt(OBS_SIZE)
    scale2 = 1.0 / jnp.sqrt(HIDDEN)
    w1 = jax.random.normal(ks[0], (OBS_SIZE, HIDDEN), jnp.float32) * scale1
    b1 = jnp.zeros((1, HIDDEN), jnp.float32)
    w2 = jax.random.normal(ks[1], (HIDDEN, HIDDEN), jnp.float32) * scale2
    b2 = jnp.zeros((1, HIDDEN), jnp.float32)
    wh = jax.random.normal(ks[2], (HIDDEN, OUT_WIDTH), jnp.float32) * scale2
    bh = jnp.zeros((1, OUT_WIDTH), jnp.float32)
    return (w1, b1, w2, b2, wh, bh)


def _reference(x, params):
    """Pure-JAX f32 reference for correctness check."""
    w1, b1, w2, b2, wh, bh = params
    h1 = jnp.tanh(x @ w1 + b1)
    h2 = jnp.tanh(h1 @ w2 + b2)
    return h2 @ wh + bh


def _check(B, k_x, params, prepped):
    x = jax.random.normal(k_x, (B, OBS_SIZE), jnp.float32)
    heads, value = agent_forward(x, prepped)
    jax.block_until_ready(value)

    # bf16 MXU operands -> loosened tolerance vs f32 reference (intentional
    # precision trade-off; document for downstream users of the logits).
    ref = _reference(x, params)
    got_heads_flat = jnp.concatenate(heads, axis=-1)
    assert jnp.allclose(got_heads_flat, ref[:, :ACTION_SIZE],
                        atol=2e-2, rtol=2e-2)
    assert jnp.allclose(value, ref[:, ACTION_SIZE], atol=2e-2, rtol=2e-2)
    assert value.shape == (B,)
    assert tuple(h.shape for h in heads) == tuple((B, hs) for hs in HEAD_SIZES)


if __name__ == "__main__":
    key = jax.random.PRNGKey(0)
    k_param, k_x1, k_x2 = jax.random.split(key, 3)

    params = init_params(k_param)
    # One-time weight preparation (bf16 casts), outside the forward path.
    prepped = prepare_params(params)

    # TODO(synk): recurrent `state` handling and torch.set_grad_enabled have no
    # Pallas equivalent in a pure forward kernel; state is treated as None.

    # Small divisible batch (grid=1) and a ragged batch (partial last block).
    _check(8, k_x1, params, prepped)
    _check(12, k_x2, params, prepped)

    print("KERNEL_OK")
</pallas_src>

<mosaic_0001>
module attributes {stable_mosaic.version = 11 : i64} {
  func.func @_ac_kernel(%arg0: i32, %arg1: memref<8x32xf32, #tpu.memory_space<vmem>>, %arg2: memref<32x64xbf16, #tpu.memory_space<vmem>>, %arg3: memref<1x64xf32, #tpu.memory_space<vmem>>, %arg4: memref<64x64xbf16, #tpu.memory_space<vmem>>, %arg5: memref<1x64xf32, #tpu.memory_space<vmem>>, %arg6: memref<64x17xbf16, #tpu.memory_space<vmem>>, %arg7: memref<1x17xf32, #tpu.memory_space<vmem>>, %arg8: memref<8x17xf32, #tpu.memory_space<vmem>>) attributes {dimension_semantics = [#tpu.dimension_semantics<parallel>], iteration_bounds = array<i64: 1>, scalar_prefetch = 0 : i64, scratch_operands = 0 : i64, tpu.core_type = #tpu.core_type<tc>, window_params = [{transform_indices = @transform_0, window_bounds = array<i64: 8, 32>}, {pipeline_mode = #tpu.pipeline_mode<synchronous>, transform_indices = @transform_1, window_bounds = array<i64: 32, 64>}, {pipeline_mode = #tpu.pipeline_mode<synchronous>, transform_indices = @transform_2, window_bounds = array<i64: 1, 64>}, {pipeline_mode = #tpu.pipeline_mode<synchronous>, transform_indices = @transform_3, window_bounds = array<i64: 64, 64>}, {pipeline_mode = #tpu.pipeline_mode<synchronous>, transform_indices = @transform_4, window_bounds = array<i64: 1, 64>}, {pipeline_mode = #tpu.pipeline_mode<synchronous>, transform_indices = @transform_5, window_bounds = array<i64: 64, 17>}, {pipeline_mode = #tpu.pipeline_mode<synchronous>, transform_indices = @transform_6, window_bounds = array<i64: 1, 17>}, {transform_indices = @transform_7, window_bounds = array<i64: 8, 17>}]} {
    %c0 = arith.constant 0 : index
    %c0_0 = arith.constant 0 : index
    %0 = vector.load %arg1[%c0, %c0_0] : memref<8x32xf32, #tpu.memory_space<vmem>>, vector<8x32xf32>
    %1 = arith.truncf %0 : vector<8x32xf32> to vector<8x32xbf16>
    %c0_1 = arith.constant 0 : index
    %c0_2 = arith.constant 0 : index
    %2 = vector.load %arg2[%c0_1, %c0_2] : memref<32x64xbf16, #tpu.memory_space<vmem>>, vector<32x64xbf16>
    %cst = arith.constant dense<0.000000e+00> : vector<8x64xf32>
    %3 = tpu.matmul %1, %2, %cst {dimension_numbers = #tpu.dot_dimension_numbers<[1], [0], [0], [1], [0, 0, 1, 1], [], []>} : vector<8x32xbf16>, vector<32x64xbf16>, vector<8x64xf32> -> vector<8x64xf32>
    %c0_3 = arith.constant 0 : index
    %c0_4 = arith.constant 0 : index
    %4 = vector.load %arg3[%c0_3, %c0_4] : memref<1x64xf32, #tpu.memory_space<vmem>>, vector<1x64xf32>
    %5 = vector.broadcast %4 : vector<1x64xf32> to vector<8x64xf32>
    %6 = arith.addf %3, %5 : vector<8x64xf32>
    %7 = math.tanh %6 : vector<8x64xf32>
    %8 = arith.truncf %7 : vector<8x64xf32> to vector<8x64xbf16>
    %c0_5 = arith.constant 0 : index
    %c0_6 = arith.constant 0 : index
    %9 = vector.load %arg4[%c0_5, %c0_6] : memref<64x64xbf16, #tpu.memory_space<vmem>>, vector<64x64xbf16>
    %cst_7 = arith.constant dense<0.000000e+00> : vector<8x64xf32>
    %10 = tpu.matmul %8, %9, %cst_7 {dimension_numbers = #tpu.dot_dimension_numbers<[1], [0], [0], [1], [0, 0, 1, 1], [], []>} : vector<8x64xbf16>, vector<64x64xbf16>, vector<8x64xf32> -> vector<8x64xf32>
    %c0_8 = arith.constant 0 : index
    %c0_9 = arith.constant 0 : index
    %11 = vector.load %arg5[%c0_8, %c0_9] : memref<1x64xf32, #tpu.memory_space<vmem>>, vector<1x64xf32>
    %12 = vector.broadcast %11 : vector<1x64xf32> to vector<8x64xf32>
    %13 = arith.addf %10, %12 : vector<8x64xf32>
    %14 = math.tanh %13 : vector<8x64xf32>
    %15 = arith.truncf %14 : vector<8x64xf32> to vector<8x64xbf16>
    %c0_10 = arith.constant 0 : index
    %c0_11 = arith.constant 0 : index
    %16 = vector.load %arg6[%c0_10, %c0_11] : memref<64x17xbf16, #tpu.memory_space<vmem>>, vector<64x17xbf16>
    %cst_12 = arith.constant dense<0.000000e+00> : vector<8x17xf32>
    %17 = tpu.matmul %15, %16, %cst_12 {dimension_numbers = #tpu.dot_dimension_numbers<[1], [0], [0], [1], [0, 0, 1, 1], [], []>} : vector<8x64xbf16>, vector<64x17xbf16>, vector<8x17xf32> -> vector<8x17xf32>
    %c0_13 = arith.constant 0 : index
    %c0_14 = arith.constant 0 : index
    %18 = vector.load %arg7[%c0_13, %c0_14] : memref<1x17xf32, #tpu.memory_space<vmem>>, vector<1x17xf32>
    %19 = vector.broadcast %18 : vector<1x17xf32> to vector<8x17xf32>
    %20 = arith.addf %17, %19 : vector<8x17xf32>
    %c0_15 = arith.constant 0 : index
    %c0_16 = arith.constant 0 : index
    %21 = vector.load %arg8[%c0_15, %c0_16] : memref<8x17xf32, #tpu.memory_space<vmem>>, vector<8x17xf32>
    tpu.vector_store %arg8[%c0_15, %c0_16], %20 {strides = array<i32>} : memref<8x17xf32, #tpu.memory_space<vmem>>, vector<8x17xf32>,
    return
  }
  func.func @transform_0(%arg0: i32) -> (i32, i32) {
    %c0_i32 = arith.constant 0 : i32
    %c0_i32_0 = arith.constant 0 : i32
    return %arg0, %c0_i32 : i32, i32
  }
  func.func @transform_1(%arg0: i32) -> (i32, i32) {
    %c0_i32 = arith.constant 0 : i32
    %c0_i32_0 = arith.constant 0 : i32
    %c0_i32_1 = arith.constant 0 : i32
    return %c0_i32, %c0_i32_0 : i32, i32
  }
  func.func @transform_2(%arg0: i32) -> (i32, i32) {
    %c0_i32 = arith.constant 0 : i32
    %c0_i32_0 = arith.constant 0 : i32
    %c0_i32_1 = arith.constant 0 : i32
    return %c0_i32, %c0_i32_0 : i32, i32
  }
  func.func @transform_3(%arg0: i32) -> (i32, i32) {
    %c0_i32 = arith.constant 0 : i32
    %c0_i32_0 = arith.constant 0 : i32
    %c0_i32_1 = arith.constant 0 : i32
    return %c0_i32, %c0_i32_0 : i32, i32
  }
  func.func @transform_4(%arg0: i32) -> (i32, i32) {
    %c0_i32 = arith.constant 0 : i32
    %c0_i32_0 = arith.constant 0 : i32
    %c0_i32_1 = arith.constant 0 : i32
    return %c0_i32, %c0_i32_0 : i32, i32
  }
  func.func @transform_5(%arg0: i32) -> (i32, i32) {
    %c0_i32 = arith.constant 0 : i32
    %c0_i32_0 = arith.constant 0 : i32
    %c0_i32_1 = arith.constant 0 : i32
    return %c0_i32, %c0_i32_0 : i32, i32
  }
  func.func @transform_6(%arg0: i32) -> (i32, i32) {
    %c0_i32 = arith.constant 0 : i32
    %c0_i32_0 = arith.constant 0 : i32
    %c0_i32_1 = arith.constant 0 : i32
    return %c0_i32, %c0_i32_0 : i32, i32
  }
  func.func @transform_7(%arg0: i32) -> (i32, i32) {
    %c0_i32 = arith.constant 0 : i32
    %c0_i32_0 = arith.constant 0 : i32
    return %arg0, %c0_i32 : i32, i32
  }
}

</mosaic_0001>

<bundles_post_ra>
// kernel: agent_forward.1
= control target key start
LH: loop header
LB: loop body
LE: loop exit
PB: predicated region body
PF: predicated region fallthrough
CT: control target
= control target key end

     0   :  { %12 = vsyncpa [#allocation3], 0  ;;  %s386_s24 = smov [#allocation2]   ;;  %s485_s0 = inlined_call_operand.hbm [shape: f32[8,32], index: 0, kind: input, shape index: {}]   ;;  %s486_s1 = inlined_call_operand.vmem [shape: bf16[32,64], index: 1, kind: input, shape index: {}]   ;;  %s487_s2 = inlined_call_operand.vmem [shape: f32[1,64], index: 2, kind: input, shape index: {}]   ;;  %s488_s3 = inlined_call_operand.vmem [shape: bf16[64,64], index: 3, kind: input, shape index: {}]   ;;  %s489_s4 = inlined_call_operand.vmem [shape: f32[1,64], index: 4, kind: input, shape index: {}]   ;;  %s490_s5 = inlined_call_operand.vmem [shape: bf16[64,17], index: 5, kind: input, shape index: {}]   ;;  %s491_s6 = inlined_call_operand.vmem [shape: f32[1,17], index: 6, kind: input, shape index: {}]   ;;  %s492_s7 = inlined_call_operand.vmem [shape: f32[8,17], index: 7, kind: output, shape index: {}]  }
   0x1   :  { %s19_s25 = sshll.u32 %s386_s24, 4  ;;  %s362_s28 = scalar_lea.hbm %s485_s0, 128  ;;  %s20_s25 = int_to_ptr.vmem [resolvable:$true] %s19_s25 }
   0x2   :  { %p363_p0 = scmp.ne.s32.totalorder %s485_s0, %s362_s28  ;;  %p366_p1 = scmp.lt.u32.totalorder %s362_s28, %s485_s0 }
   0x4   :  { %p368_p2 = pnand %p366_p1, %p363_p0 }
   0x6   :  { %371 = shalt.err (!%p368_p2)
}
   0x7   :  { %s372_s10 = scalar_lea.vmem %s20_s25, 128  ;;  %p377_p4 = scmp.lt.s32.totalorder %s20_s25, %s20_s25 }
   0x8   :  { %p373_p3 = scmp.ne.s32.totalorder %s20_s25, %s372_s10  ;;  %p378_p5 = scmp.lt.s32.totalorder %s372_s10, %s372_s10 }
   0xa   :  { %p379_p6 = por %p378_p5, %p377_p4 }
   0xc   :  { %p380_p7 = pnand %p379_p6, %p373_p3 }
   0xe   :  { %383 = shalt.err (!%p380_p7)
}
   0xf   :  { %22 = dma.hbm_to_vmem [thread:$0]  %s485_s0, 128, %s20_s25, [#allocation3]  }
  0x10   :  { %384 = dma.done.wait [#allocation3], 128  }
  0x11   :  { %385 = vsyncadd [#allocation3], 4294967168  ;;  %v387_v0 = vmov 0.0   ;;  %vm388_vm0 = vmmov 0   ;;  %v348_v1 = vld [vmem:[%s486_s1] sm:$0xff]   ;;  %v349_v2 = vld [vmem:[%s486_s1 + $0x8] sm:$0xff]  }
  0x12   :  { %313 = vmatprep.subr.bf16.mxu0 %v387_v0  ;;  %317 = vmatprep.mubr.msk.bf16.mxu0 %vm388_vm0, %v387_v0  ;;  %v39_v3 = vld [vmem:[#allocation2] sm:$0xff]  ;;  %vm64_vm1 = vcmask 261120   ;;  %v351_v6 = vld [vmem:[%s488_s3 + $0x8] sm:$0xff]   ;;  %v352_v7 = vld [vmem:[%s488_s3 + $0x10] sm:$0xff]   ;;  %vm149_vm2 = vcmask 523264   ;;  %vm277_vm3 = vcmask 138240  }
  0x13   :  { %321 = vmatprep.subr.bf16.mxu1 %v387_v0  ;;  %329 = vmatprep.mubr.msk.bf16.mxu1 %vm388_vm0, %v387_v0  ;;  %v40_v4 = vpack.c.bf16 %v39_v3, %v39_v3  ;;  %v350_v5 = vld [vmem:[%s488_s3] sm:$0xff]   ;;  %v353_v8 = vld [vmem:[%s488_s3 + $0x18] sm:$0xff]   ;;  %v355_v18 = vld [vmem:[%s490_s5 + $0x8] sm:$0xff]  }
  0x14   :  { %314 = vmatpush3.bf16.msra.mxu0 %v348_v1  ;;  %322 = vmatpush3.bf16.msra.mxu1 %v350_v5  ;;  %v284_v9 = vld [vmem:[%s487_s2] ss:$0 sm:$0xff]  ;;  %v356_v19 = vld [vmem:[%s490_s5 + $0x10] sm:$0xff]   ;;  %v357_v20 = vld [vmem:[%s490_s5 + $0x18] sm:$0xff]  }
  0x15   :  { %315 = vmatprep.subr.bf16.mxu0 %v387_v0  ;;  %323 = vmatprep.subr.bf16.mxu1 %v387_v0  ;;  %v354_v17 = vld [vmem:[%s490_s5] sm:$0xff]  }
  0x16   :  { %v288_v21 = vld [vmem:[%s489_s4] ss:$0 sm:$0xff] }
  0x17   :  { %v294_v29 = vld [vmem:[%s491_s6] ss:$0 sm:$0xff] }
  0x18   :  { %316 = vmatpush3.bf16.msra.mxu0 %v349_v2  ;;  %324 = vmatpush3.bf16.msra.mxu1 %v351_v6 }
  0x19   :  { %333 = vmatprep.subr.bf16.mxu0 %v387_v0  ;;  %325 = vmatprep.subr.bf16.mxu1 %v387_v0 }
  0x1b   :  { %318 = vmatmul.mubr.msk.bf16.vlgmr.msra.gmra.mrb[0].mxu0 %vm64_vm1, %v40_v4 }
  0x1c   :  { %341 = vmatprep.mubr.msk.bf16.mxu0 %vm388_vm0, %v387_v0  ;;  %326 = vmatpush3.bf16.msra.mxu1 %v352_v7 }
  0x1d   :  { %327 = vmatprep.subr.bf16.mxu1 %v387_v0  ;;  %334 = vmatpush3.bf16.msra.mxu0 %v354_v17 }
  0x1e   :  { %335 = vmatprep.subr.bf16.mxu0 %v387_v0 }
  0x20   :  { %328 = vmatpush3.bf16.msra.mxu1 %v353_v8 }
  0x21   :  { %336 = vmatpush3.bf16.msra.mxu0 %v355_v18 }
  0x22   :  { %337 = vmatprep.subr.bf16.mxu0 %v387_v0 }
  0x25   :  { %338 = vmatpush3.bf16.msra.mxu0 %v356_v19 }
  0x26   :  { %339 = vmatprep.subr.bf16.mxu0 %v387_v0 }
  0x29   :  { %340 = vmatpush3.bf16.msra.mxu0 %v357_v20 }
  0xee   :  { %v102_v10 = vpop.f32.mrb[0].mxu0 }
  0xef   :  { %v103_v11 = vadd.f32 %v284_v9, %v102_v10  ;;  %v319_v12 = vpop.f32.mrb[1].mxu0 }
  0xf0   :  { %v105_v13 = vpop.f32.mrb[2].mxu0 }
  0xf1   :  { %358 = vtanh.f32 %v103_v11  ;;  %v320_v14 = vpop.f32.mrb[3].mxu0 }
  0xfb   :  { %v359_v15 = vpop.eup %358 }
  0xfc   :  { %v109_v16 = vpack.c.bf16 %v359_v15, %v359_v15 }
  0xfe   :  { %330 = vmatmul.mubr.msk.bf16.vlgmr.msra.gmra.mrb[0].mxu1 %vm149_vm2, %v109_v16 }
 0x1d1   :  { %v187_v22 = vpop.f32.mrb[0].mxu1 }
 0x1d2   :  { %v188_v23 = vadd.f32 %v288_v21, %v187_v22  ;;  %v331_v24 = vpop.f32.mrb[1].mxu1 }
 0x1d3   :  { %v190_v25 = vpop.f32.mrb[2].mxu1 }
 0x1d4   :  { %360 = vtanh.f32 %v188_v23  ;;  %v332_v26 = vpop.f32.mrb[3].mxu1 }
 0x1de   :  { %v361_v27 = vpop.eup %360 }
 0x1df   :  { %v194_v28 = vpack.c.bf16 %v361_v27, %v361_v27 }
 0x1e1   :  { %342 = vmatmul.mubr.msk.bf16.vlgmr.msra.gmra.mrb[4].mxu0 %vm149_vm2, %v194_v28 }
 0x2b4   :  { %v271_v30 = vpop.f32.mrb[4].mxu0 }
 0x2b5   :  { %v272_v31 = vadd.f32 %v294_v29, %v271_v30  ;;  %v343_v32 = vpop.f32.mrb[5].mxu0 }
 0x2b6   :  { %v274_v33 = vpop.f32.mrb[6].mxu0 }
 0x2b7   :  { %278 = vst.msk [vmem:[%s492_s7] sm:$0xff] %vm277_vm3, %v272_v31  ;;  %v344_v34 = vpop.f32.mrb[7].mxu0 }
 0x2b8   :  { %283 = vsyncpa [#allocation3], 1 }

</bundles_post_ra>
